<compile_context>
chip_gen: v6e
topology: v6e:2x2x1
jax: 0.10.0
libtpu: 0.0.40
codegen_flags: <defaults>
</compile_context>

<pallas_src>
import functools

import numpy as np
import jax
import jax.numpy as jnp
from jax.experimental import pallas as pl
from jax.experimental.pallas import tpu as pltpu


def _round_up(x, m):
    return ((x + m - 1) // m) * m


def _vmem_limit_bytes():
    """Pick a scoped-VMEM limit per generation (v5e/v6e: 128 MiB physical ->
    96 MiB; v7x: 64 MiB physical -> 32 MiB, leaving Mosaic scratch headroom)."""
    cap = 64 * 1024 * 1024
    try:
        info = pltpu.get_tpu_info()
        cap = int(getattr(info, "vmem_capacity_bytes", cap))
    except Exception:
        pass
    return 96 * 1024 * 1024 if cap >= 100 * 1024 * 1024 else 32 * 1024 * 1024


def _est_vmem_bytes(tb, tn, Din, E, Cp):
    """Rough per-step VMEM footprint (double-buffered inputs + scratch + temps)."""
    x = 2 * 2 * tb * tn * Din * 4                 # act + acw f32 blocks
    w = 2 * 2 * Din * E * 2                       # bf16 projection weights
    pe = 2 * 2 * tn * E * 4                       # f32 positional encodings
    bias = 2 * 2 * E * 4
    wcls = 2 * 2 * E * Cp * 2 + 2 * Cp * 4        # bf16 classifier halves + bias
    acc = 2 * tb * E * 4                          # running sums
    out = 2 * tb * Cp * 4
    tmp = 2 * tb * tn * (Din * 2 + E * 4)         # in-kernel bf16 x + f32 embeddings
    return x + w + pe + bias + wcls + acc + out + tmp


def _choose_tiles(B, N, Din, E, Cp, budget):
    """Pick (tb, tn, Np): tn multiple of 8 (seq padded up to Np), tb a divisor
    of B, targeting tb*tn ~ 512 MXU rows under the VMEM budget."""
    Np = _round_up(N, 8)
    tn = min(512, Np)
    Np = _round_up(N, tn)

    divs = [d for d in range(1, B + 1) if B % d == 0]
    cap = max(1, 512 // tn)
    tb = max(d for d in divs if d <= cap)
    # Keep >=2 steps on the parallel (batch) axis when possible so the grid can
    # shard across TensorCores (v7x megacore); harmless no-op on 1-TC chips.
    if B >= 2 and B // tb < 2:
        tb = max(d for d in divs if d <= max(1, B // 2))

    while _est_vmem_bytes(tb, tn, Din, E, Cp) > budget:
        if tn > 8:
            tn = max(8, (tn // 2) // 8 * 8)
            Np = _round_up(N, tn)
        else:
            smaller = [d for d in divs if d < tb]
            if not smaller:
                break
            tb = max(smaller)
    return tb, tn, Np


# -----------------------------------------------------------------------------
# Fused kernel: patch-embed (both streams) + bias + PE + seq-sum + classifier.
#   grid = (B//tb, Np//tn); axis 1 is the sequence reduction ("arbitrary").
# -----------------------------------------------------------------------------
def _fused_forward_kernel(
    xa_ref, xw_ref,           # (tb, tn, Din) f32 patch tiles (act / acw)
    wa_ref, ww_ref,           # (Din, E) bf16 projection weights (resident)
    ba_ref, bw_ref,           # (1, E)   f32 projection biases
    pea_ref, pew_ref,         # (tn, E)  f32 positional encodings (reused over batch)
    wct_ref, wcb_ref,         # (E, Cp)  bf16 classifier weight halves
    bc_ref,                   # (1, Cp)  f32 classifier bias
    o_ref,                    # (tb, 1, Cp) f32 logits (written at finalize)
    acc_a_ref, acc_w_ref,     # (tb, E) f32 running seq-sums (VMEM scratch)
    *, n_valid, n_padded, inv_n,
):
    nt = pl.program_id(1)

    @pl.when(nt == 0)
    def _init():
        acc_a_ref[...] = jnp.zeros_like(acc_a_ref)
        acc_w_ref[...] = jnp.zeros_like(acc_w_ref)

    tb, tn, din = xa_ref.shape
    e = wa_ref.shape[1]

    # Collapse (batch-tile, seq-tile) into one M axis so the MXU sees full
    # (tb*tn, Din) tiles; cast to bf16 in VMEM (patches stay f32 in HBM, so no
    # separate convert/copy pass of the largest input is ever needed).
    xa = xa_ref[...].reshape(tb * tn, din).astype(jnp.bfloat16)
    xw = xw_ref[...].reshape(tb * tn, din).astype(jnp.bfloat16)

    ea = jnp.dot(xa, wa_ref[...], preferred_element_type=jnp.float32)
    ew = jnp.dot(xw, ww_ref[...], preferred_element_type=jnp.float32)
    ea = ea.reshape(tb, tn, e) + ba_ref[...][None] + pea_ref[...][None]
    ew = ew.reshape(tb, tn, e) + bw_ref[...][None] + pew_ref[...][None]

    if n_valid != n_padded:  # static check: mask zero-padded sequence rows
        pos = nt * tn + jax.lax.broadcasted_iota(jnp.int32, (tn, e), 0)
        keep = (pos < n_valid)[None]
        ea = jnp.where(keep, ea, 0.0)
        ew = jnp.where(keep, ew, 0.0)

    # TODO(synk): the pretrained `amazon/chronos-t5-base` T5 backbone has no
    # in-script Pallas equivalent; it is an identity passthrough, so the fused
    # embeddings feed the mean-pool directly and are never written to HBM.
    acc_a_ref[...] += jnp.sum(ea, axis=1)
    acc_w_ref[...] += jnp.sum(ew, axis=1)

    @pl.when(nt == pl.num_programs(1) - 1)
    def _finalize():
        pa = (acc_a_ref[...] * inv_n).astype(jnp.bfloat16)   # mean over seq
        pw = (acc_w_ref[...] * inv_n).astype(jnp.bfloat16)
        logits = (
            jnp.dot(pa, wct_ref[...], preferred_element_type=jnp.float32)
            + jnp.dot(pw, wcb_ref[...], preferred_element_type=jnp.float32)
            + bc_ref[...]
        )
        o_ref[...] = logits[:, None, :]


# -----------------------------------------------------------------------------
# Sinusoidal positional encoding (matches get_sinusoidal_positional_encoding).
# -----------------------------------------------------------------------------
def sinusoidal_pe(num_patches, embedding_dim, start_times):
    assert embedding_dim % 2 == 0, "embedding_dim must be even"
    positions = jnp.asarray(start_times, dtype=jnp.float32)[:, None]      # (N, 1)
    div_term = jnp.exp(
        jnp.arange(0, embedding_dim, 2, dtype=jnp.float32)
        * (-np.log(10000.0) / embedding_dim)
    )                                                                     # (E/2,)
    ang = positions * div_term                                            # (N, E/2)
    pe = jnp.zeros((num_patches, embedding_dim), dtype=jnp.float32)
    pe = pe.at[:, 0::2].set(jnp.sin(ang))
    pe = pe.at[:, 1::2].set(jnp.cos(ang))
    return pe


# -----------------------------------------------------------------------------
# Full forward (single pallas_call).
# -----------------------------------------------------------------------------
def chronos_activity_classifier_forward(act_patches, acw_patches,
                                        act_times, acw_times, params):
    B, N = act_patches.shape[0], act_patches.shape[1]
    Din = int(np.prod(act_patches.shape[2:]))
    E = params["w_act"].shape[1]
    C = params["w_cls"].shape[1]
    Cp = _round_up(C, 128)

    vmem_limit = _vmem_limit_bytes()
    tb, tn, Np = _choose_tiles(B, N, Din, E, Cp, budget=int(vmem_limit * 0.75))

    # x.view(B, N, -1): free metadata reshape; patches stay f32 into the kernel.
    xa = act_patches.reshape(B, N, Din).astype(jnp.float32)
    xw = acw_patches.reshape(B, N, Din).astype(jnp.float32)

    # Per-stream PE kept at (N, E) — reused across the batch via the index_map.
    # NOTE: start_times are per-sequence (shape (N,)) as in the PyTorch module.
    pe_a = sinusoidal_pe(N, E, act_times)
    pe_w = sinusoidal_pe(N, E, acw_times)

    if Np != N:  # pad sequence up to the tile; masked inside the kernel
        xa = jnp.pad(xa, ((0, 0), (0, Np - N), (0, 0)))
        xw = jnp.pad(xw, ((0, 0), (0, Np - N), (0, 0)))
        pe_a = jnp.pad(pe_a, ((0, Np - N), (0, 0)))
        pe_w = jnp.pad(pe_w, ((0, Np - N), (0, 0)))

    wa = params["w_act"].astype(jnp.bfloat16)
    ww = params["w_acw"].astype(jnp.bfloat16)
    ba = params["b_act"].reshape(1, E).astype(jnp.float32)
    bw = params["b_acw"].reshape(1, E).astype(jnp.float32)

    # Classifier: split (2E, C) into act/acw halves, pad C up to a 128-multiple
    # so the logits store is lane-dense; bf16 weights, f32 bias/accumulation.
    w_cls = params["w_cls"].astype(jnp.float32)
    wct = jnp.pad(w_cls[:E], ((0, 0), (0, Cp - C))).astype(jnp.bfloat16)
    wcb = jnp.pad(w_cls[E:], ((0, 0), (0, Cp - C))).astype(jnp.bfloat16)
    bc = jnp.pad(params["b_cls"].reshape(1, C).astype(jnp.float32),
                 ((0, 0), (0, Cp - C)))

    grid = (B // tb, Np // tn)
    kernel = functools.partial(_fused_forward_kernel,
                               n_valid=N, n_padded=Np, inv_n=float(1.0 / N))

    cost = pl.CostEstimate(
        flops=int(2 * 2 * B * Np * Din * E + 2 * 2 * B * E * Cp),
        transcendentals=0,
        bytes_accessed=int(2 * B * Np * Din * 4 + 2 * Din * E * 2
                           + 2 * Np * E * 4 + 2 * E * 4
                           + 2 * E * Cp * 2 + Cp * 4 + B * Cp * 4),
    )

    logits_pad = pl.pallas_call(
        kernel,
        out_shape=jax.ShapeDtypeStruct((B, 1, Cp), jnp.float32),
        grid=grid,
        in_specs=[
            pl.BlockSpec((tb, tn, Din), lambda b, n: (b, n, 0)),   # act patches
            pl.BlockSpec((tb, tn, Din), lambda b, n: (b, n, 0)),   # acw patches
            pl.BlockSpec((Din, E), lambda b, n: (0, 0)),           # w_act (resident)
            pl.BlockSpec((Din, E), lambda b, n: (0, 0)),           # w_acw (resident)
            pl.BlockSpec((1, E), lambda b, n: (0, 0)),             # b_act
            pl.BlockSpec((1, E), lambda b, n: (0, 0)),             # b_acw
            pl.BlockSpec((tn, E), lambda b, n: (n, 0)),            # pe_act
            pl.BlockSpec((tn, E), lambda b, n: (n, 0)),            # pe_acw
            pl.BlockSpec((E, Cp), lambda b, n: (0, 0)),            # classifier W (act half)
            pl.BlockSpec((E, Cp), lambda b, n: (0, 0)),            # classifier W (acw half)
            pl.BlockSpec((1, Cp), lambda b, n: (0, 0)),            # classifier bias
        ],
        out_specs=pl.BlockSpec((tb, 1, Cp), lambda b, n: (b, 0, 0)),
        scratch_shapes=[
            pltpu.VMEM((tb, E), jnp.float32),
            pltpu.VMEM((tb, E), jnp.float32),
        ],
        compiler_params=pltpu.CompilerParams(
            dimension_semantics=("parallel", "arbitrary"),
            vmem_limit_bytes=vmem_limit,
        ),
        cost_estimate=cost,
    )(xa, xw, wa, ww, ba, bw, pe_a, pe_w, wct, wcb, bc)

    return logits_pad[:, 0, :C]


# -----------------------------------------------------------------------------
# Pure-JAX f32 reference for a sanity check.
# -----------------------------------------------------------------------------
def reference_forward(act_patches, acw_patches, act_times, acw_times, params):
    B, N = act_patches.shape[0], act_patches.shape[1]
    E = params["w_act"].shape[1]
    act2 = act_patches.reshape(B, N, -1).astype(jnp.float32)
    acw2 = acw_patches.reshape(B, N, -1).astype(jnp.float32)
    act_emb = act2 @ params["w_act"] + params["b_act"] + sinusoidal_pe(N, E, act_times)[None]
    acw_emb = acw2 @ params["w_acw"] + params["b_acw"] + sinusoidal_pe(N, E, acw_times)[None]
    fused = jnp.concatenate([act_emb, acw_emb], axis=-1)
    pooled = fused.mean(axis=1)       # backbone = identity passthrough
    return pooled @ params["w_cls"] + params["b_cls"]


# -----------------------------------------------------------------------------
# Main
# -----------------------------------------------------------------------------
if __name__ == "__main__":
    # Small, forward-consistent, lane-aligned shapes:
    #   B=2 sequences, N=8 patches, per-patch raw (4, 32) -> Din=128,
    #   embedding_dim E=128 (512 in the original), num_classes C=10.
    B, N = 2, 8
    patch_h, patch_w = 4, 32
    Din = patch_h * patch_w
    E = 128
    C = 10

    key = jax.random.PRNGKey(0)
    k_act, k_acw, k_wa, k_ba, k_ww, k_bw, k_wc, k_bc = jax.random.split(key, 8)

    act_patches = jax.random.normal(k_act, (B, N, patch_h, patch_w), dtype=jnp.float32)
    acw_patches = jax.random.normal(k_acw, (B, N, patch_h, patch_w), dtype=jnp.float32)
    act_times = np.arange(N, dtype=np.float32) * 5.0
    acw_times = np.arange(N, dtype=np.float32) * 5.0 + 2.5

    # nn.Linear weights stored pre-transposed as (in, out).
    params = {
        "w_act": jax.random.normal(k_wa, (Din, E), dtype=jnp.float32) * 0.02,
        "b_act": jax.random.normal(k_ba, (1, E), dtype=jnp.float32) * 0.02,
        "w_acw": jax.random.normal(k_ww, (Din, E), dtype=jnp.float32) * 0.02,
        "b_acw": jax.random.normal(k_bw, (1, E), dtype=jnp.float32) * 0.02,
        "w_cls": jax.random.normal(k_wc, (2 * E, C), dtype=jnp.float32) * 0.02,
        "b_cls": jax.random.normal(k_bc, (1, C), dtype=jnp.float32) * 0.02,
    }

    logits = chronos_activity_classifier_forward(
        act_patches, acw_patches, act_times, acw_times, params
    )
    jax.block_until_ready(logits)
    assert logits.shape == (B, C), logits.shape
    assert bool(jnp.all(jnp.isfinite(logits)))

    ref = reference_forward(act_patches, acw_patches, act_times, acw_times, params)
    max_err = float(jnp.max(jnp.abs(logits - ref)))
    assert max_err < 5e-2, f"max abs error {max_err}"

    print("KERNEL_OK")
</pallas_src>

<mosaic_0001>
module attributes {stable_mosaic.version = 11 : i64} {
  func.func @_fused_forward_kernel(%arg0: i32, %arg1: i32, %arg2: memref<1x8x128xf32, #tpu.memory_space<vmem>>, %arg3: memref<1x8x128xf32, #tpu.memory_space<vmem>>, %arg4: memref<128x128xbf16, #tpu.memory_space<vmem>>, %arg5: memref<128x128xbf16, #tpu.memory_space<vmem>>, %arg6: memref<1x128xf32, #tpu.memory_space<vmem>>, %arg7: memref<1x128xf32, #tpu.memory_space<vmem>>, %arg8: memref<8x128xf32, #tpu.memory_space<vmem>>, %arg9: memref<8x128xf32, #tpu.memory_space<vmem>>, %arg10: memref<128x128xbf16, #tpu.memory_space<vmem>>, %arg11: memref<128x128xbf16, #tpu.memory_space<vmem>>, %arg12: memref<1x128xf32, #tpu.memory_space<vmem>>, %arg13: memref<1x1x128xf32, #tpu.memory_space<vmem>>, %arg14: memref<1x128xf32, #tpu.memory_space<vmem>>, %arg15: memref<1x128xf32, #tpu.memory_space<vmem>>) attributes {dimension_semantics = [#tpu.dimension_semantics<parallel>, #tpu.dimension_semantics<arbitrary>], iteration_bounds = array<i64: 2, 1>, scalar_prefetch = 0 : i64, scratch_operands = 2 : i64, tpu.core_type = #tpu.core_type<tc>, window_params = [{transform_indices = @transform_0, window_bounds = array<i64: 1, 8, 128>}, {transform_indices = @transform_1, window_bounds = array<i64: 1, 8, 128>}, {pipeline_mode = #tpu.pipeline_mode<synchronous>, transform_indices = @transform_2, window_bounds = array<i64: 128, 128>}, {pipeline_mode = #tpu.pipeline_mode<synchronous>, transform_indices = @transform_3, window_bounds = array<i64: 128, 128>}, {pipeline_mode = #tpu.pipeline_mode<synchronous>, transform_indices = @transform_4, window_bounds = array<i64: 1, 128>}, {pipeline_mode = #tpu.pipeline_mode<synchronous>, transform_indices = @transform_5, window_bounds = array<i64: 1, 128>}, {transform_indices = @transform_6, window_bounds = array<i64: 8, 128>}, {transform_indices = @transform_7, window_bounds = array<i64: 8, 128>}, {pipeline_mode = #tpu.pipeline_mode<synchronous>, transform_indices = @transform_8, window_bounds = array<i64: 128, 128>}, {pipeline_mode = #tpu.pipeline_mode<synchronous>, transform_indices = @transform_9, window_bounds = array<i64: 128, 128>}, {pipeline_mode = #tpu.pipeline_mode<synchronous>, transform_indices = @transform_10, window_bounds = array<i64: 1, 128>}, {transform_indices = @transform_11, window_bounds = array<i64: 1, 1, 128>}]} {
    %c0_i32 = arith.constant 0 : i32
    %0 = arith.cmpi eq, %arg1, %c0_i32 : i32
    %1 = arith.extui %0 : i1 to i32
    %c0_i32_0 = arith.constant 0 : i32
    %2 = arith.cmpi ne, %1, %c0_i32_0 : i32
    scf.if %2 {
      %cst_31 = arith.constant 0.000000e+00 : f32
      %40 = vector.broadcast %cst_31 : f32 to vector<1x128xf32>
      %c0_32 = arith.constant 0 : index
      %c0_33 = arith.constant 0 : index
      %41 = vector.load %arg14[%c0_32, %c0_33] : memref<1x128xf32, #tpu.memory_space<vmem>>, vector<1x128xf32>
      tpu.vector_store %arg14[%c0_32, %c0_33], %40 {strides = array<i32>} : memref<1x128xf32, #tpu.memory_space<vmem>>, vector<1x128xf32>,
      %cst_34 = arith.constant 0.000000e+00 : f32
      %42 = vector.broadcast %cst_34 : f32 to vector<1x128xf32>
      %c0_35 = arith.constant 0 : index
      %c0_36 = arith.constant 0 : index
      %43 = vector.load %arg15[%c0_35, %c0_36] : memref<1x128xf32, #tpu.memory_space<vmem>>, vector<1x128xf32>
      tpu.vector_store %arg15[%c0_35, %c0_36], %42 {strides = array<i32>} : memref<1x128xf32, #tpu.memory_space<vmem>>, vector<1x128xf32>,
    } else {
    }
    %c0 = arith.constant 0 : index
    %c0_1 = arith.constant 0 : index
    %c0_2 = arith.constant 0 : index
    %3 = vector.load %arg2[%c0, %c0_1, %c0_2] : memref<1x8x128xf32, #tpu.memory_space<vmem>>, vector<1x8x128xf32>
    %4 = vector.shape_cast %3 : vector<1x8x128xf32> to vector<8x128xf32>
    %5 = arith.truncf %4 : vector<8x128xf32> to vector<8x128xbf16>
    %c0_3 = arith.constant 0 : index
    %c0_4 = arith.constant 0 : index
    %c0_5 = arith.constant 0 : index
    %6 = vector.load %arg3[%c0_3, %c0_4, %c0_5] : memref<1x8x128xf32, #tpu.memory_space<vmem>>, vector<1x8x128xf32>
    %7 = vector.shape_cast %6 : vector<1x8x128xf32> to vector<8x128xf32>
    %8 = arith.truncf %7 : vector<8x128xf32> to vector<8x128xbf16>
    %c0_6 = arith.constant 0 : index
    %c0_7 = arith.constant 0 : index
    %9 = vector.load %arg4[%c0_6, %c0_7] : memref<128x128xbf16, #tpu.memory_space<vmem>>, vector<128x128xbf16>
    %cst = arith.constant dense<0.000000e+00> : vector<8x128xf32>
    %10 = tpu.matmul %5, %9, %cst {dimension_numbers = #tpu.dot_dimension_numbers<[1], [0], [0], [1], [0, 0, 1, 1], [], []>} : vector<8x128xbf16>, vector<128x128xbf16>, vector<8x128xf32> -> vector<8x128xf32>
    %c0_8 = arith.constant 0 : index
    %c0_9 = arith.constant 0 : index
    %11 = vector.load %arg5[%c0_8, %c0_9] : memref<128x128xbf16, #tpu.memory_space<vmem>>, vector<128x128xbf16>
    %cst_10 = arith.constant dense<0.000000e+00> : vector<8x128xf32>
    %12 = tpu.matmul %8, %11, %cst_10 {dimension_numbers = #tpu.dot_dimension_numbers<[1], [0], [0], [1], [0, 0, 1, 1], [], []>} : vector<8x128xbf16>, vector<128x128xbf16>, vector<8x128xf32> -> vector<8x128xf32>
    %13 = vector.shape_cast %10 : vector<8x128xf32> to vector<1x8x128xf32>
    %c0_11 = arith.constant 0 : index
    %c0_12 = arith.constant 0 : index
    %14 = vector.load %arg6[%c0_11, %c0_12] : memref<1x128xf32, #tpu.memory_space<vmem>>, vector<1x128xf32>
    %15 = vector.shape_cast %14 : vector<1x128xf32> to vector<1x1x128xf32>
    %16 = vector.broadcast %15 : vector<1x1x128xf32> to vector<1x8x128xf32>
    %17 = arith.addf %13, %16 : vector<1x8x128xf32>
    %c0_13 = arith.constant 0 : index
    %c0_14 = arith.constant 0 : index
    %18 = vector.load %arg8[%c0_13, %c0_14] : memref<8x128xf32, #tpu.memory_space<vmem>>, vector<8x128xf32>
    %19 = vector.shape_cast %18 : vector<8x128xf32> to vector<1x8x128xf32>
    %20 = arith.addf %17, %19 : vector<1x8x128xf32>
    %21 = vector.shape_cast %12 : vector<8x128xf32> to vector<1x8x128xf32>
    %c0_15 = arith.constant 0 : index
    %c0_16 = arith.constant 0 : index
    %22 = vector.load %arg7[%c0_15, %c0_16] : memref<1x128xf32, #tpu.memory_space<vmem>>, vector<1x128xf32>
    %23 = vector.shape_cast %22 : vector<1x128xf32> to vector<1x1x128xf32>
    %24 = vector.broadcast %23 : vector<1x1x128xf32> to vector<1x8x128xf32>
    %25 = arith.addf %21, %24 : vector<1x8x128xf32>
    %c0_17 = arith.constant 0 : index
    %c0_18 = arith.constant 0 : index
    %26 = vector.load %arg9[%c0_17, %c0_18] : memref<8x128xf32, #tpu.memory_space<vmem>>, vector<8x128xf32>
    %27 = vector.shape_cast %26 : vector<8x128xf32> to vector<1x8x128xf32>
    %28 = arith.addf %25, %27 : vector<1x8x128xf32>
    %c0_19 = arith.constant 0 : index
    %c0_20 = arith.constant 0 : index
    %29 = vector.load %arg14[%c0_19, %c0_20] : memref<1x128xf32, #tpu.memory_space<vmem>>, vector<1x128xf32>
    %cst_21 = arith.constant dense<0.000000e+00> : vector<1x128xf32>
    %30 = vector.multi_reduction <add>, %20, %cst_21 [1] : vector<1x8x128xf32> to vector<1x128xf32>
    %31 = arith.addf %29, %30 : vector<1x128xf32>
    %c0_22 = arith.constant 0 : index
    %c0_23 = arith.constant 0 : index
    %32 = vector.load %arg14[%c0_22, %c0_23] : memref<1x128xf32, #tpu.memory_space<vmem>>, vector<1x128xf32>
    tpu.vector_store %arg14[%c0_22, %c0_23], %31 {strides = array<i32>} : memref<1x128xf32, #tpu.memory_space<vmem>>, vector<1x128xf32>,
    %c0_24 = arith.constant 0 : index
    %c0_25 = arith.constant 0 : index
    %33 = vector.load %arg15[%c0_24, %c0_25] : memref<1x128xf32, #tpu.memory_space<vmem>>, vector<1x128xf32>
    %cst_26 = arith.constant dense<0.000000e+00> : vector<1x128xf32>
    %34 = vector.multi_reduction <add>, %28, %cst_26 [1] : vector<1x8x128xf32> to vector<1x128xf32>
    %35 = arith.addf %33, %34 : vector<1x128xf32>
    %c0_27 = arith.constant 0 : index
    %c0_28 = arith.constant 0 : index
    %36 = vector.load %arg15[%c0_27, %c0_28] : memref<1x128xf32, #tpu.memory_space<vmem>>, vector<1x128xf32>
    tpu.vector_store %arg15[%c0_27, %c0_28], %35 {strides = array<i32>} : memref<1x128xf32, #tpu.memory_space<vmem>>, vector<1x128xf32>,
    %c0_i32_29 = arith.constant 0 : i32
    %37 = arith.cmpi eq, %arg1, %c0_i32_29 : i32
    %38 = arith.extui %37 : i1 to i32
    %c0_i32_30 = arith.constant 0 : i32
    %39 = arith.cmpi ne, %38, %c0_i32_30 : i32
    scf.if %39 {
      %c0_31 = arith.constant 0 : index
      %c0_32 = arith.constant 0 : index
      %40 = vector.load %arg14[%c0_31, %c0_32] : memref<1x128xf32, #tpu.memory_space<vmem>>, vector<1x128xf32>
      %cst_33 = arith.constant 1.250000e-01 : f32
      %41 = vector.broadcast %cst_33 : f32 to vector<1x128xf32>
      %42 = arith.mulf %40, %41 : vector<1x128xf32>
      %43 = arith.truncf %42 : vector<1x128xf32> to vector<1x128xbf16>
      %c0_34 = arith.constant 0 : index
      %c0_35 = arith.constant 0 : index
      %44 = vector.load %arg15[%c0_34, %c0_35] : memref<1x128xf32, #tpu.memory_space<vmem>>, vector<1x128xf32>
      %cst_36 = arith.constant 1.250000e-01 : f32
      %45 = vector.broadcast %cst_36 : f32 to vector<1x128xf32>
      %46 = arith.mulf %44, %45 : vector<1x128xf32>
      %47 = arith.truncf %46 : vector<1x128xf32> to vector<1x128xbf16>
      %c0_37 = arith.constant 0 : index
      %c0_38 = arith.constant 0 : index
      %48 = vector.load %arg10[%c0_37, %c0_38] : memref<128x128xbf16, #tpu.memory_space<vmem>>, vector<128x128xbf16>
      %cst_39 = arith.constant dense<0.000000e+00> : vector<1x128xf32>
      %49 = tpu.matmul %43, %48, %cst_39 {dimension_numbers = #tpu.dot_dimension_numbers<[1], [0], [0], [1], [0, 0, 1, 1], [], []>} : vector<1x128xbf16>, vector<128x128xbf16>, vector<1x128xf32> -> vector<1x128xf32>
      %c0_40 = arith.constant 0 : index
      %c0_41 = arith.constant 0 : index
      %50 = vector.load %arg11[%c0_40, %c0_41] : memref<128x128xbf16, #tpu.memory_space<vmem>>, vector<128x128xbf16>
      %cst_42 = arith.constant dense<0.000000e+00> : vector<1x128xf32>
      %51 = tpu.matmul %47, %50, %cst_42 {dimension_numbers = #tpu.dot_dimension_numbers<[1], [0], [0], [1], [0, 0, 1, 1], [], []>} : vector<1x128xbf16>, vector<128x128xbf16>, vector<1x128xf32> -> vector<1x128xf32>
      %52 = arith.addf %49, %51 : vector<1x128xf32>
      %c0_43 = arith.constant 0 : index
      %c0_44 = arith.constant 0 : index
      %53 = vector.load %arg12[%c0_43, %c0_44] : memref<1x128xf32, #tpu.memory_space<vmem>>, vector<1x128xf32>
      %54 = arith.addf %52, %53 : vector<1x128xf32>
      %55 = vector.shape_cast %54 : vector<1x128xf32> to vector<1x1x128xf32>
      %c0_45 = arith.constant 0 : index
      %c0_46 = arith.constant 0 : index
      %c0_47 = arith.constant 0 : index
      %56 = vector.load %arg13[%c0_45, %c0_46, %c0_47] : memref<1x1x128xf32, #tpu.memory_space<vmem>>, vector<1x1x128xf32>
      tpu.vector_store %arg13[%c0_45, %c0_46, %c0_47], %55 {strides = array<i32>} : memref<1x1x128xf32, #tpu.memory_space<vmem>>, vector<1x1x128xf32>,
    } else {
    }
    return
  }
  func.func @transform_0(%arg0: i32, %arg1: i32) -> (i32, i32, i32) {
    %c0_i32 = arith.constant 0 : i32
    %c0_i32_0 = arith.constant 0 : i32
    return %arg0, %arg1, %c0_i32 : i32, i32, i32
  }
  func.func @transform_1(%arg0: i32, %arg1: i32) -> (i32, i32, i32) {
    %c0_i32 = arith.constant 0 : i32
    %c0_i32_0 = arith.constant 0 : i32
    return %arg0, %arg1, %c0_i32 : i32, i32, i32
  }
  func.func @transform_2(%arg0: i32, %arg1: i32) -> (i32, i32) {
    %c0_i32 = arith.constant 0 : i32
    %c0_i32_0 = arith.constant 0 : i32
    %c0_i32_1 = arith.constant 0 : i32
    return %c0_i32, %c0_i32_0 : i32, i32
  }
  func.func @transform_3(%arg0: i32, %arg1: i32) -> (i32, i32) {
    %c0_i32 = arith.constant 0 : i32
    %c0_i32_0 = arith.constant 0 : i32
    %c0_i32_1 = arith.constant 0 : i32
    return %c0_i32, %c0_i32_0 : i32, i32
  }
  func.func @transform_4(%arg0: i32, %arg1: i32) -> (i32, i32) {
    %c0_i32 = arith.constant 0 : i32
    %c0_i32_0 = arith.constant 0 : i32
    %c0_i32_1 = arith.constant 0 : i32
    return %c0_i32, %c0_i32_0 : i32, i32
  }
  func.func @transform_5(%arg0: i32, %arg1: i32) -> (i32, i32) {
    %c0_i32 = arith.constant 0 : i32
    %c0_i32_0 = arith.constant 0 : i32
    %c0_i32_1 = arith.constant 0 : i32
    return %c0_i32, %c0_i32_0 : i32, i32
  }
  func.func @transform_6(%arg0: i32, %arg1: i32) -> (i32, i32) {
    %c0_i32 = arith.constant 0 : i32
    %c0_i32_0 = arith.constant 0 : i32
    return %arg1, %c0_i32 : i32, i32
  }
  func.func @transform_7(%arg0: i32, %arg1: i32) -> (i32, i32) {
    %c0_i32 = arith.constant 0 : i32
    %c0_i32_0 = arith.constant 0 : i32
    return %arg1, %c0_i32 : i32, i32
  }
  func.func @transform_8(%arg0: i32, %arg1: i32) -> (i32, i32) {
    %c0_i32 = arith.constant 0 : i32
    %c0_i32_0 = arith.constant 0 : i32
    %c0_i32_1 = arith.constant 0 : i32
    return %c0_i32, %c0_i32_0 : i32, i32
  }
  func.func @transform_9(%arg0: i32, %arg1: i32) -> (i32, i32) {
    %c0_i32 = arith.constant 0 : i32
    %c0_i32_0 = arith.constant 0 : i32
    %c0_i32_1 = arith.constant 0 : i32
    return %c0_i32, %c0_i32_0 : i32, i32
  }
  func.func @transform_10(%arg0: i32, %arg1: i32) -> (i32, i32) {
    %c0_i32 = arith.constant 0 : i32
    %c0_i32_0 = arith.constant 0 : i32
    %c0_i32_1 = arith.constant 0 : i32
    return %c0_i32, %c0_i32_0 : i32, i32
  }
  func.func @transform_11(%arg0: i32, %arg1: i32) -> (i32, i32, i32) {
    %c0_i32 = arith.constant 0 : i32
    %c0_i32_0 = arith.constant 0 : i32
    %c0_i32_1 = arith.constant 0 : i32
    return %arg0, %c0_i32, %c0_i32_0 : i32, i32, i32
  }
}

</mosaic_0001>

<bundles_post_ra>
// kernel: tpu_custom_call.1
= control target key start
LH: loop header
LB: loop body
LE: loop exit
PB: predicated region body
PF: predicated region fallthrough
CT: control target
= control target key end

     0   :  { %s2196_s0 = inlined_call_operand.hbm [shape: f32[2,8,128], index: 0, kind: input, shape index: {}]   ;;  %s2197_s1 = inlined_call_operand.hbm [shape: f32[2,8,128], index: 1, kind: input, shape index: {}]   ;;  %s2198_s2 = inlined_call_operand.hbm [shape: bf16[128,128], index: 2, kind: input, shape index: {}]   ;;  %s2199_s3 = inlined_call_operand.hbm [shape: bf16[128,128], index: 3, kind: input, shape index: {}]   ;;  %s2200_s4 = inlined_call_operand.vmem [shape: f32[1,128], index: 4, kind: input, shape index: {}]   ;;  %s2201_s5 = inlined_call_operand.vmem [shape: f32[1,128], index: 5, kind: input, shape index: {}]   ;;  %s2202_s6 = inlined_call_operand.vmem [shape: f32[8,128], index: 6, kind: input, shape index: {}]   ;;  %s2203_s7 = inlined_call_operand.hbm [shape: f32[8,128], index: 7, kind: input, shape index: {}]   ;;  %s2204_s8 = inlined_call_operand.hbm [shape: bf16[128,128], index: 8, kind: input, shape index: {}]   ;;  %s2205_s9 = inlined_call_operand.hbm [shape: bf16[128,128], index: 9, kind: input, shape index: {}]   ;;  %s2206_s10 = inlined_call_operand.vmem [shape: f32[1,128], index: 10, kind: input, shape index: {}]   ;;  %s2207_s11 = inlined_call_operand.hbm [shape: f32[2,1,128], index: 11, kind: output, shape index: {}]  }
   0x1   :  { %2213 = sst [smem:[#allocation26_spill]] %s2198_s2 }
   0x2   :  { %2214 = sst [smem:[#allocation27_spill]] %s2199_s3 }
   0x3   :  { %2215 = sst [smem:[#allocation28_spill]] %s2203_s7 }
   0x4   :  { %2216 = sst [smem:[#allocation29_spill]] %s2204_s8 }
   0x5   :  { %2217 = sst [smem:[#allocation30_spill]] %s2205_s9 }
   0x6   :  { %2218 = sst [smem:[#allocation31_spill]] %s2207_s11 }
   0x7   :  { %16 = vsyncpa [#allocation5], 0 }
   0x8   :  { %18 = vsyncpa [#allocation5 + $0x1], 0 }
   0x9   :  { %19 = vsyncpa [#allocation8], 0 }
   0xa   :  { %21 = vsyncpa [#allocation8 + $0x1], 0 }
   0xb   :  { %22 = vsyncpa [#allocation11], 0 }
   0xc   :  { %23 = vsyncpa [#allocation14], 0 }
   0xd   :  { %24 = vsyncpa [#allocation6], 0 }
   0xe   :  { %26 = vsyncpa [#allocation6 + $0x1], 0  ;;  %s1888_s17 = smov 0   ;;  %s1890_s18 = smov 0  }
   0xf   :  { %s1892_s19 = smov 0   ;;  %s1894_s20 = smov 0  }
  0x10   :  { %s1896_s21 = smov 0   ;;  %s1898_s22 = smov 0  }
  0x11 LB: > { %2219 = sst [smem:[#allocation23_spill]] %s1810_s21  ;;  %s1919_s23 = sadd.s32 4294967295, %s1814_s22   ;;  %s1814_s22 = sphi %s1898_s22, %s32_s22   ;;  %s1810_s21 = sphi %s1896_s21, %s2247_s21   ;;  %s1806_s20 = sphi %s1894_s20, %s2246_s20   ;;  %s1802_s19 = sphi %s1892_s19, %s2250_s19   ;;  %s1798_s18 = sphi %s1890_s18, %s2249_s18   ;;  %s1794_s17 = sphi %s1888_s17, %s2248_s17  }
  0x12   : > { %p1205_p0 = scmp.ge.s32.totalorder %s1814_s22, 1  ;;  %p2209_p1 = scmp.eq.s32.totalorder %s1919_s23, 0 }
  0x13   : > { %p330_p2 = scmp.lt.s32.totalorder %s1814_s22, 3  ;;  %s1816_s25 = smov [#allocation9]  }
  0x14   : > { %s342_s26 = sshll.u32 %s1816_s25, 4  ;;  %s1817_s28 = smov [#allocation10]   ;;  %s343_s26 = int_to_ptr.vmem [resolvable:$true] %s342_s26 }
  0x15   : > { %p1924_p3 = pnand %p1205_p0, %p330_p2  ;;  %s355_s29 = sshll.u32 %s1817_s28, 4  ;;  %s356_s29 = int_to_ptr.vmem [resolvable:$true] %s355_s29 }
  0x16   : > { %s1818_s30 = smov [#allocation13]   ;;  %s1543_s14 = scalar_lea.vmem %s343_s26, 1024 }
  0x17   : > { %s2220_s24 = scalar_select %p1924_p3, 1, 0 }
  0x18   : > { %p1404_p4 = pneg %p1924_p3  ;;  %s394_s12 = sshll.u32 %s1818_s30, 4  ;;  %s395_s12 = int_to_ptr.vmem [resolvable:$true] %s394_s12 }
  0x19   : > { %p1544_p8 = scmp.ne.s32.totalorder %s343_s26, %s1543_s14  ;;  %p1551_p11 = scmp.lt.s32.totalorder %s343_s26, %s343_s26 }
  0x1a   : > { %p1933_p6 = pnand %p1404_p4, %p2209_p1  ;;  %p1552_p12 = scmp.lt.s32.totalorder %s1543_s14, %s1543_s14 }
  0x1c   : > { %p1939_p7 = pneg %p1933_p6  ;;  %p1553_p13 = por %p1552_p12, %p1551_p11 }
  0x1e   : > { %p1546_p9 = pnand %p1544_p8, %p1939_p7 }
  0x20   : > { %p1547_p10 = pneg %p1546_p9 }
  0x22   : > { %p1554_p0 = pnand %p1553_p13, %p1547_p10 }
  0x24   : > { %1557 = shalt.err (!%p1554_p0)
}
  0x25   : > { %s1819_s15 = smov 64   ;;  %s1820_s16 = smov 4  }
  0x26   : > { %s2223_s2 = sld [smem:[#allocation26_spill]]  ;;  %s1569_s30 = scalar_lea.vmem %s356_s29, 1024 }
  0x27   : > { %p1570_p2 = scmp.ne.s32.totalorder %s356_s29, %s1569_s30  ;;  %p1577_p9 = scmp.lt.s32.totalorder %s356_s29, %s356_s29 }
  0x28   : > { %p1578_p10 = scmp.lt.s32.totalorder %s1569_s30, %s1569_s30 }
  0x29   : > { %p1572_p4 = pnand %p1570_p2, %p1939_p7 }
  0x2a   : > { %p1579_p11 = por %p1578_p10, %p1577_p9 }
  0x2b   : > { %p1573_p8 = pneg %p1572_p4 }
  0x2c   : > { %1407 = dma.hbm_to_vmem [thread:$0]  (!%p1933_p6), %s2223_s2, 1024, %s343_s26, [#allocation8], %s1819_s15, %s1819_s15, %s1820_s16  }
  0x2d   : > { %p1580_p12 = pnand %p1579_p11, %p1573_p8 }
  0x2f   : > { %1583 = shalt.err (!%p1580_p12)
}
  0x30   : > { %s2224_s3 = sld [smem:[#allocation27_spill]]  ;;  %s1595_s26 = scalar_lea.vmem %s395_s12, 1024 }
  0x31   : > { %p1596_p13 = scmp.ne.s32.totalorder %s395_s12, %s1595_s26  ;;  %p1603_p4 = scmp.lt.s32.totalorder %s395_s12, %s395_s12 }
  0x32   : > { %p1604_p9 = scmp.lt.s32.totalorder %s1595_s26, %s1595_s26 }
  0x33   : > { %p1598_p0 = pnand %p1596_p13, %p1939_p7 }
  0x34   : > { %p1605_p8 = por %p1604_p9, %p1603_p4 }
  0x35   : > { %p1599_p2 = pneg %p1598_p0 }
  0x36   : > { %1410 = dma.hbm_to_vmem [thread:$0]  (!%p1933_p6), %s2224_s3, 1024, %s356_s29, [#allocation11], %s1819_s15, %s1819_s15, %s1820_s16  }
  0x37   : > { %p1606_p10 = pnand %p1605_p8, %p1599_p2 }
  0x39   : > { %1609 = shalt.err (!%p1606_p10)
}
  0x3a   : > { %s2225_s8 = sld [smem:[#allocation29_spill]]  ;;  %s1821_s29 = smov [#allocation12]  }
  0x3b   : > { %s384_s28 = sshll.u32 %s1821_s29, 4  ;;  %s1822_s30 = smov [#allocation15]   ;;  %s385_s28 = int_to_ptr.vmem [resolvable:$true] %s384_s28 }
  0x3c   : > { %s407_s14 = sshll.u32 %s1822_s30, 4  ;;  %s1621_s2 = scalar_lea.vmem %s385_s28, 128  ;;  %s408_s14 = int_to_ptr.vmem [resolvable:$true] %s407_s14 }
  0x3d   : > { %p1622_p11 = scmp.ne.s32.totalorder %s385_s28, %s1621_s2  ;;  %p1629_p0 = scmp.lt.s32.totalorder %s385_s28, %s385_s28 }
  0x3e   : > { %p1630_p2 = scmp.lt.s32.totalorder %s1621_s2, %s1621_s2 }
  0x3f   : > { %p1624_p12 = pnand %p1622_p11, %p1939_p7 }
  0x40   : > { %1416 = dma.hbm_to_vmem [thread:$0]  (!%p1933_p6), %s2225_s8, 1024, %s395_s12, [#allocation14], %s1819_s15, %s1819_s15, %s1820_s16  }
  0x41   : > { %p1625_p13 = pneg %p1624_p12  ;;  %p1631_p4 = por %p1630_p2, %p1629_p0 }
  0x43   : > { %p1632_p9 = pnand %p1631_p4, %p1625_p13 }
  0x45   : > { %1635 = shalt.err (!%p1632_p9)
}
  0x46   : > { %s2226_s7 = sld [smem:[#allocation28_spill]]  ;;  %s1647_s12 = scalar_lea.vmem %s408_s14, 1024 }
  0x47   : > { %p1648_p8 = scmp.ne.s32.totalorder %s408_s14, %s1647_s12  ;;  %p1655_p11 = scmp.lt.s32.totalorder %s408_s14, %s408_s14 }
  0x48   : > { %p1656_p12 = scmp.lt.s32.totalorder %s1647_s12, %s1647_s12 }
  0x49   : > { %p1650_p10 = pnand %p1648_p8, %p1939_p7 }
  0x4a   : > { %p1657_p1 = por %p1656_p12, %p1655_p11 }
  0x4b   : > { %p1651_p5 = pneg %p1650_p10 }
  0x4c   : > { %1413 = dma.hbm_to_vmem [thread:$0]  (!%p1933_p6), %s2226_s7, 128, %s385_s28, [#allocation11]  }
  0x4d   : > { %p1658_p3 = pnand %p1657_p1, %p1651_p5 }
  0x4f   : > { %1661 = shalt.err (!%p1658_p3)
}
  0x50   : > { %s2227_s9 = sld [smem:[#allocation30_spill]]  ;;  %s1204_s27 = sadd.s32 4294967294, %s1814_s22  }
  0x51   : > { %s44_s13 = sadd.s32 1, %s1810_s21  ;;  %s53_s29 = sadd.s32 1, %s1802_s19 }
  0x52   : > { %p46_p1 = scmp.ge.s32.totalorder %s44_s13, 2  ;;  %p60_p3 = scmp.ne.s32.totalorder %s1802_s19, %s1798_s18 }
  0x53   : > { %p61_p5 = scmp.eq.s32.totalorder %s1814_s22, 0  ;;  %p66_p7 = scmp.ne.s32.totalorder %s1798_s18, %s1794_s17 }
  0x54   : > { %s2252_s13 = smov (%p46_p1, %s44_s13), 0  ;;  %p2230_p0 = scmp.eq.s32.totalorder %s1919_s23, 0 }
  0x55   : > { %2228 = sst [smem:[#allocation24_spill]] %s2252_s13  ;;  %p2000_p13 = por %p61_p5, %p60_p3 }
  0x56   : > { %1419 = dma.hbm_to_vmem [thread:$0]  (!%p1933_p6), %s2227_s9, 1024, %s408_s14, [#allocation14], %s1819_s15, %s1819_s15, %s1820_s16  }
  0x57   : > { %p2006_p6 = por %p2230_p0, %p66_p7  ;;  %s48_s16 = ssub.s32 %s1810_s21, %s2252_s13 }
  0x58   : > { %p317_p2 = scmp.eq.s32.totalorder %s1919_s23, 1  ;;  %p51_p4 = scmp.eq.s32.totalorder %s48_s16, 0 }
  0x59   : > { %p323_p9 = scmp.eq.s32.totalorder %s1204_s27, 1  ;;  %p1436_p10 = scmp.lt.s32.totalorder %s1814_s22, 2 }
  0x5a   : > { %p2013_p8 = por %p317_p2, %p60_p3  ;;  %s424_s25 = sand.u32 1, %s1802_s19  }
  0x5b   : > { %s2019_s14 = scalar_select %p51_p4, %s1802_s19, %s53_s29  }
  0x5c   : > { %p2021_p11 = por %p323_p9, %p66_p7  ;;  %s1213_s12 = sshll.u32 %s424_s25, 3 }
  0x5d   : > { %2233 = sst [smem:[#allocation25_spill]] %s2019_s14  ;;  %s1214_s2 = sshll.u32 %s1810_s21, 7 }
  0x5e   : > { %s434_s7 = scalar_lea.hbm %s2196_s0, %s1214_s2  ;;  %s428_s16 = scalar_lea.vmem [#allocation4], %s1213_s12 }
  0x5f   : > { %s436_s27 = sshll.u32 %s428_s16, 4  ;;  %p2032_p12 = pnand %p1436_p10, %p2000_p13  ;;  %s437_s27 = int_to_ptr.vmem [resolvable:$true] %s436_s27 }
  0x60   : > { %s2039_s13 = scalar_lea.hbm %s2197_s1, %s1214_s2  ;;  %s443_s21 = sand.u32 1, %s1814_s22  }
  0x61   : > { %s425_s14 = scalar_lea.sflag [#allocation5], %s424_s25  ;;  %p1664_p1 = pneg %p2032_p12 }
  0x62   : > { %s1675_s3 = scalar_lea.vmem %s437_s27, 128  ;;  %s1823_s28 = smov [#allocation4]  }
  0x63   : > { %p1676_p3 = scmp.ne.s32.totalorder %s437_s27, %s1675_s3  ;;  %s1680_s11 = sshll.u32 %s1823_s28, 4  ;;  %s1681_s11 = int_to_ptr.vmem [resolvable:$false] %s1680_s11 }
  0x64   : > { %s1682_s16 = scalar_lea.vmem %s1681_s11, 256  ;;  %p1683_p13 = scmp.lt.s32.totalorder %s437_s27, %s1681_s11 }
  0x65   : > { %p1678_p5 = pnand %p1676_p3, %p1664_p1  ;;  %p1684_p0 = scmp.lt.s32.totalorder %s1682_s16, %s1675_s3 }
  0x67   : > { %p1679_p7 = pneg %p1678_p5  ;;  %p1685_p2 = por %p1684_p0, %p1683_p13 }
  0x69   : > { %p1686_p4 = pnand %p1685_p2, %p1679_p7 }
  0x6b   : > { %1689 = shalt.err (!%p1686_p4)
}
  0x6c   : > { %1423 = dma.hbm_to_vmem [thread:$0]  (!%p2032_p12), %s434_s7, 128, %s437_s27, %s425_s14  }
  0x6d   : > { %s447_s9 = scalar_lea.vmem [#allocation7], %s1213_s12  ;;  %s444_s2 = scalar_lea.sflag [#allocation8], %s443_s21 }
  0x6e   : > { %s455_s25 = sshll.u32 %s447_s9, 4  ;;  %s1824_s28 = smov [#allocation7]   ;;  %s456_s25 = int_to_ptr.vmem [resolvable:$true] %s455_s25 }
  0x6f   : > { %s1703_s29 = scalar_lea.vmem %s456_s25, 128  ;;  %s1708_s11 = sshll.u32 %s1824_s28, 4  ;;  %s1709_s11 = int_to_ptr.vmem [resolvable:$false] %s1708_s11 }
  0x70   : > { %p1704_p9 = scmp.ne.s32.totalorder %s456_s25, %s1703_s29  ;;  %s1710_s3 = scalar_lea.vmem %s1709_s11, 256 }
  0x71   : > { %p1711_p5 = scmp.lt.s32.totalorder %s456_s25, %s1709_s11  ;;  %p1712_p7 = scmp.lt.s32.totalorder %s1710_s3, %s1703_s29 }
  0x72   : > { %p1706_p10 = pnand %p1704_p9, %p1664_p1 }
  0x73   : > { %p1713_p13 = por %p1712_p7, %p1711_p5 }
  0x74   : > { %p1707_p3 = pneg %p1706_p10 }
  0x76   : > { %p1714_p0 = pnand %p1713_p13, %p1707_p3 }
  0x78   : > { %1717 = shalt.err (!%p1714_p0)
}
  0x79   : > { %1426 = dma.hbm_to_vmem [thread:$0]  (!%p2032_p12), %s2039_s13, 128, %s456_s25, %s444_s2  }
  0x7a   : > { %p2236_p2 = scmp.ne.s32.totalorder %s2220_s24, 0 }
  0x7b   : > { %s2058_s7 = sand.u32 (!%p2236_p2), 1, %s1798_s18  }
  0x7c   : > { %464 = sbr.rel (%p2236_p2) target bundleno = 611 (0x263), region = 64  ;;  %s1218_s21 = sshll.u32 (!%p2236_p2), %s2058_s7, 3 }
  0x7d   : > { %s467_s14 = scalar_lea.sflag (!%p2236_p2), [#allocation5], %s2058_s7  ;;  %s2062_s12 = scalar_lea.vmem (!%p2236_p2), [#allocation4], %s1218_s21 }
  0x81   : > { %1769 = dma.done.wait (%p2006_p6), %s467_s14, 128  }
  0x82   : > { %1771 = vsyncadd (%p2006_p6), %s467_s14, 4294967168  ;;  %s475_s8 = sand.u32 1, %s1919_s23   ;;  %s2069_s13 = scalar_lea.vmem [#allocation7], %s1218_s21 }
  0x83   : > { %s476_s24 = scalar_lea.sflag [#allocation8], %s475_s8 }
  0x84   : > { %1773 = dma.done.wait (%p2006_p6), %s476_s24, 128  }
  0x85   : > { %1775 = vsyncadd (%p2006_p6), %s476_s24, 4294967168  ;;  %p2237_p12 = scmp.eq.s32.totalorder %s1919_s23, 0 }
  0x87   : > { %1777 = dma.done.wait (%p2237_p12), [#allocation8], 1024   ;;  %p2238_p1 = pmov %p2237_p12 }
  0x89   : > { %1779 = vsyncadd (%p2238_p1), [#allocation8], 4294966272  ;;  %p2239_p4 = pmov %p2238_p1 }
  0x8a   : > { %p2240_p9 = pmov %p2238_p1 }
  0x8b   : > { %1781 = dma.done.wait (%p2239_p4), [#allocation11], 1152  }
  0x8c   : > { %1783 = vsyncadd (%p2240_p9), [#allocation11], 4294966144  ;;  %p2241_p10 = pmov %p2238_p1 }
  0x8d   : > { %p2242_p3 = pmov %p2238_p1 }
  0x8e   : > { %1785 = dma.done.wait (%p2241_p10), [#allocation14], 2048  }
  0x8f   : > { %1787 = vsyncadd (%p2242_p3), [#allocation14], 4294965248  ;;  %v1825_v0 = vmov 0.0   ;;  %vm1826_vm0 = vmmov 0   ;;  %v1500_v1 = vld [vmem:[#allocation9 + $0x38] sm:$0xff]   ;;  %v1502_v3 = vld [vmem:[#allocation9 + $0x30] sm:$0xff]  }
  0x90   : > { %1298 = vmatprep.subr.bf16.mxu0 %v1825_v0  ;;  %555 = vst [vmem:[#allocation2] sm:$0x1] %v1825_v0  ;;  %556 = vst [vmem:[#allocation3] sm:$0x1] %v1825_v0  ;;  %1318 = vmatprep.subr.bf16.mxu1 %v1825_v0  ;;  %v1501_v2 = vld [vmem:[#allocation10 + $0x38] sm:$0xff]   ;;  %v1503_v4 = vld [vmem:[#allocation10 + $0x30] sm:$0xff]  }
  0x91   : > { %1314 = vmatprep.mubr.msk.bf16.mxu0 %vm1826_vm0, %v1825_v0  ;;  %1334 = vmatprep.mubr.msk.bf16.mxu1 %vm1826_vm0, %v1825_v0  ;;  %v1504_v5 = vld [vmem:[#allocation9 + $0x28] sm:$0xff]   ;;  %v1506_v7 = vld [vmem:[#allocation9 + $0x20] sm:$0xff]   ;;  %v1508_v9 = vld [vmem:[#allocation9 + $0x18] sm:$0xff]   ;;  %s1259_s28 = sshll.u32 %s1806_s20, 4  ;;  %s545_s11 = scalar_lea.vmem [#allocation16], %s2058_s7 }
  0x92   : > { %1299 = vmatpush3.bf16.msra.mxu0 %v1500_v1  ;;  %1319 = vmatpush3.bf16.msra.mxu1 %v1501_v2  ;;  %v1505_v6 = vld [vmem:[#allocation10 + $0x28] sm:$0xff]   ;;  %v1507_v8 = vld [vmem:[#allocation10 + $0x20] sm:$0xff]   ;;  %v1509_v10 = vld [vmem:[#allocation10 + $0x18] sm:$0xff]   ;;  %s1040_s3 = sshll.u32 %s545_s11, 4  ;;  %s1028_s20 = scalar_lea.sflag [#allocation6], %s2058_s7  ;;  %s2150_s3 = int_to_ptr.vmem [resolvable:$true] %s1040_s3 }
  0x93   : > { %1300 = vmatprep.subr.bf16.mxu0 %v1825_v0  ;;  %1320 = vmatprep.subr.bf16.mxu1 %v1825_v0  ;;  %v1510_v11 = vld [vmem:[#allocation9 + $0x10] sm:$0xff]   ;;  %v1512_v13 = vld [vmem:[#allocation9 + $0x8] sm:$0xff]   ;;  %v1514_v15 = vld [vmem:[#allocation9] sm:$0xff]   ;;  %s1718_s24 = scalar_lea.vmem %s2150_s3, 16 }
  0x94   : > { %v1511_v12 = vld [vmem:[#allocation10 + $0x10] sm:$0xff]   ;;  %v1513_v14 = vld [vmem:[#allocation10 + $0x8] sm:$0xff]   ;;  %v1515_v17 = vld [vmem:[#allocation10] sm:$0xff]   ;;  %p1719_p6 = scmp.ne.s32.totalorder %s2150_s3, %s1718_s24 }
  0x95   : > { %v557_v16 = vld [vmem:[%s2062_s12] sm:$0xff]  ;;  %v559_v18 = vld [vmem:[%s2069_s13] sm:$0xff]  ;;  %s2243_s12 = sld [smem:[#allocation31_spill]]  ;;  %s1827_s13 = smov [#allocation16]  }
  0x96   : > { %1301 = vmatpush3.bf16.msra.mxu0 %v1502_v3  ;;  %1321 = vmatpush3.bf16.msra.mxu1 %v1503_v4  ;;  %v558_v19 = vpack.c.bf16 %v557_v16, %v557_v16  ;;  %v560_v20 = vpack.c.bf16 %v559_v18, %v559_v18  ;;  %v1516_v21 = vld [vmem:[#allocation15 + $0x38] sm:$0xff]   ;;  %v1518_v23 = vld [vmem:[#allocation15 + $0x30] sm:$0xff]   ;;  %v1520_v25 = vld [vmem:[#allocation15 + $0x28] sm:$0xff]   ;;  %p1720_p5 = pnand %p1719_p6, %p2013_p8  ;;  %s1722_s23 = sshll.u32 %s1827_s13, 4  ;;  %s1723_s23 = int_to_ptr.vmem [resolvable:$false] %s1722_s23 }
  0x97   : > { %1302 = vmatprep.subr.bf16.mxu0 %v1825_v0  ;;  %1322 = vmatprep.subr.bf16.mxu1 %v1825_v0  ;;  %v1517_v22 = vld [vmem:[#allocation13 + $0x38] sm:$0xff]   ;;  %v1519_v24 = vld [vmem:[#allocation13 + $0x30] sm:$0xff]   ;;  %v1521_v26 = vld [vmem:[#allocation13 + $0x28] sm:$0xff]   ;;  %s1724_s15 = scalar_lea.vmem %s1723_s23, 32  ;;  %p1725_p13 = scmp.lt.s32.totalorder %s2150_s3, %s1723_s23 }
  0x98   : > { %v1522_v27 = vld [vmem:[#allocation15 + $0x20] sm:$0xff]   ;;  %v1524_v29 = vld [vmem:[#allocation15 + $0x18] sm:$0xff]   ;;  %v1526_v31 = vld [vmem:[#allocation15 + $0x10] sm:$0xff]   ;;  %p1721_p7 = pneg %p1720_p5  ;;  %p1726_p0 = scmp.lt.s32.totalorder %s1724_s15, %s1718_s24 }
  0x99   : > { %v1523_v28 = vld [vmem:[#allocation13 + $0x20] sm:$0xff]   ;;  %v1525_v30 = vld [vmem:[#allocation13 + $0x18] sm:$0xff]   ;;  %v1527_v32 = vld [vmem:[#allocation13 + $0x10] sm:$0xff]  }
  0x9a   : > { %1303 = vmatpush3.bf16.msra.mxu0 %v1504_v5  ;;  %1323 = vmatpush3.bf16.msra.mxu1 %v1505_v6  ;;  %v1528_v33 = vld [vmem:[#allocation15 + $0x8] sm:$0xff]   ;;  %v1530_v35 = vld [vmem:[#allocation15] sm:$0xff]   ;;  %v1241_v37 = vld [vmem:[%s2200_s4] ss:$0 sm:$0xff]  ;;  %p1727_p2 = por %p1726_p0, %p1725_p13 }
  0x9b   : > { %1304 = vmatprep.subr.bf16.mxu0 %v1825_v0  ;;  %1324 = vmatprep.subr.bf16.mxu1 %v1825_v0  ;;  %v1529_v34 = vld [vmem:[#allocation13 + $0x8] sm:$0xff]   ;;  %v1531_v36 = vld [vmem:[#allocation13] sm:$0xff]   ;;  %v1242_v38 = vld [vmem:[%s2201_s5] ss:$0 sm:$0xff]  ;;  %s2148_s8 = scalar_lea.hbm %s2243_s12, %s1259_s28 }
  0x9c   : > { %v777_v40 = vld [vmem:[%s2202_s6] sm:$0xff]  ;;  %p1728_p12 = pnand %p1727_p2, %p1721_p7 }
  0x9d   : > { %v787_v43 = vld [vmem:[#allocation12] sm:$0xff]  ;;  %v789_v62 = vld [vmem:[#allocation2] sm:$0x1]  ;;  %v798_v1 = vld [vmem:[#allocation3] sm:$0x1] }
  0x9e   : > { %1305 = vmatpush3.bf16.msra.mxu0 %v1506_v7  ;;  %1325 = vmatpush3.bf16.msra.mxu1 %v1507_v8 }
  0x9f   : > { %1306 = vmatprep.subr.bf16.mxu0 %v1825_v0  ;;  %1326 = vmatprep.subr.bf16.mxu1 %v1825_v0 }
  0xa2   : > { %1307 = vmatpush3.bf16.msra.mxu0 %v1508_v9  ;;  %1327 = vmatpush3.bf16.msra.mxu1 %v1509_v10 }
  0xa3   : > { %1308 = vmatprep.subr.bf16.mxu0 %v1825_v0  ;;  %1328 = vmatprep.subr.bf16.mxu1 %v1825_v0 }
  0xa6   : > { %1309 = vmatpush3.bf16.msra.mxu0 %v1510_v11  ;;  %1329 = vmatpush3.bf16.msra.mxu1 %v1511_v12 }
  0xa7   : > { %1310 = vmatprep.subr.bf16.mxu0 %v1825_v0  ;;  %1330 = vmatprep.subr.bf16.mxu1 %v1825_v0 }
  0xaa   : > { %1311 = vmatpush3.bf16.msra.mxu0 %v1512_v13  ;;  %1331 = vmatpush3.bf16.msra.mxu1 %v1513_v14  ;;  %v1024_v13 = vld [vmem:[%s2206_s10] sm:$0x1] }
  0xab   : > { %1312 = vmatprep.subr.bf16.mxu0 %v1825_v0  ;;  %1332 = vmatprep.subr.bf16.mxu1 %v1825_v0 }
  0xae   : > { %1313 = vmatpush3.bf16.msra.mxu0 %v1514_v15  ;;  %1333 = vmatpush3.bf16.msra.mxu1 %v1515_v17 }
  0xaf   : > { %1338 = vmatprep.subr.bf16.mxu0 %v1825_v0  ;;  %1358 = vmatprep.subr.bf16.mxu1 %v1825_v0 }
  0xb1   : > { %1315 = vmatmul.mubr.bf16.vlgmr.msra.gmra.mxu0 %v558_v19  ;;  %1335 = vmatmul.mubr.bf16.vlgmr.msra.gmra.mxu1 %v560_v20 }
  0xb2   : > { %1354 = vmatprep.mubr.msk.bf16.mxu0 %vm1826_vm0, %v1825_v0  ;;  %1374 = vmatprep.mubr.msk.bf16.mxu1 %vm1826_vm0, %v1825_v0 }
  0xb3   : > { %1339 = vmatpush3.bf16.msra.mxu0 %v1516_v21  ;;  %1359 = vmatpush3.bf16.msra.mxu1 %v1517_v22 }
  0xb4   : > { %1340 = vmatprep.subr.bf16.mxu0 %v1825_v0  ;;  %1360 = vmatprep.subr.bf16.mxu1 %v1825_v0 }
  0xb7   : > { %1341 = vmatpush3.bf16.msra.mxu0 %v1518_v23  ;;  %1361 = vmatpush3.bf16.msra.mxu1 %v1519_v24 }
  0xb8   : > { %1342 = vmatprep.subr.bf16.mxu0 %v1825_v0  ;;  %1362 = vmatprep.subr.bf16.mxu1 %v1825_v0 }
  0xbb   : > { %1343 = vmatpush3.bf16.msra.mxu0 %v1520_v25  ;;  %1363 = vmatpush3.bf16.msra.mxu1 %v1521_v26 }
  0xbc   : > { %1344 = vmatprep.subr.bf16.mxu0 %v1825_v0  ;;  %1364 = vmatprep.subr.bf16.mxu1 %v1825_v0 }
  0xbf   : > { %1345 = vmatpush3.bf16.msra.mxu0 %v1522_v27  ;;  %1365 = vmatpush3.bf16.msra.mxu1 %v1523_v28 }
  0xc0   : > { %1346 = vmatprep.subr.bf16.mxu0 %v1825_v0  ;;  %1366 = vmatprep.subr.bf16.mxu1 %v1825_v0 }
  0xc3   : > { %1347 = vmatpush3.bf16.msra.mxu0 %v1524_v29  ;;  %1367 = vmatpush3.bf16.msra.mxu1 %v1525_v30 }
  0xc4   : > { %1348 = vmatprep.subr.bf16.mxu0 %v1825_v0  ;;  %1368 = vmatprep.subr.bf16.mxu1 %v1825_v0 }
  0xc7   : > { %1349 = vmatpush3.bf16.msra.mxu0 %v1526_v31  ;;  %1369 = vmatpush3.bf16.msra.mxu1 %v1527_v32 }
  0xc8   : > { %1350 = vmatprep.subr.bf16.mxu0 %v1825_v0  ;;  %1370 = vmatprep.subr.bf16.mxu1 %v1825_v0 }
  0xcb   : > { %1351 = vmatpush3.bf16.msra.mxu0 %v1528_v33  ;;  %1371 = vmatpush3.bf16.msra.mxu1 %v1529_v34 }
  0xcc   : > { %1352 = vmatprep.subr.bf16.mxu0 %v1825_v0  ;;  %1372 = vmatprep.subr.bf16.mxu1 %v1825_v0 }
  0xcf   : > { %1353 = vmatpush3.bf16.msra.mxu0 %v1530_v35  ;;  %1373 = vmatpush3.bf16.msra.mxu1 %v1531_v36 }
 0x171   : > { %v659_v39 = vpop.f32.mrf.mxu0  ;;  %v763_v42 = vpop.f32.mrf.mxu1 }
 0x172   : > { %v776_v41 = vadd.f32 %v1241_v37, %v659_v39  ;;  %v786_v44 = vadd.f32 %v1242_v38, %v763_v42 }
 0x173   : > { %v1316_v45 = vpop.f32.mrf.mxu0  ;;  %v1336_v47 = vpop.f32.mrf.mxu1 }
 0x174   : > { %v778_v46 = vadd.f32 %v777_v40, %v776_v41  ;;  %v788_v48 = vadd.f32 %v787_v43, %v786_v44 }
 0x175   : > { %v662_v49 = vpop.f32.mrf.mxu0  ;;  %v766_v51 = vpop.f32.mrf.mxu1 }
 0x176   : > { %v790_v50 = vrot.slane %v778_v46, 4  ;;  %v799_v52 = vrot.slane %v788_v48, 4 }
 0x177   : > { %v1317_v53 = vpop.f32.mrf.mxu0  ;;  %v1337_v55 = vpop.f32.mrf.mxu1 }
 0x178   : > { %v791_v54 = vadd.f32 %v790_v50, %v778_v46  ;;  %v800_v56 = vadd.f32 %v799_v52, %v788_v48 }
 0x17a   : > { %v792_v57 = vrot.slane %v791_v54, 2  ;;  %v801_v58 = vrot.slane %v800_v56, 2 }
 0x17c   : > { %v793_v59 = vadd.f32 %v792_v57, %v791_v54  ;;  %v802_v60 = vadd.f32 %v801_v58, %v800_v56 }
 0x17e   : > { %v794_v61 = vrot.slane %v793_v59, 1  ;;  %v803_v63 = vrot.slane %v802_v60, 1 }
 0x180   : > { %v795_v0 = vadd.f32 %v794_v61, %v793_v59  ;;  %v804_v2 = vadd.f32 %v803_v63, %v802_v60 }
 0x182   : > { %v796_v3 = vadd.f32 %v795_v0, %v789_v62  ;;  %v805_v4 = vadd.f32 %v804_v2, %v798_v1 }
 0x184   : > { %797 = vst [vmem:[#allocation2] sm:$0x1] %v796_v3  ;;  %806 = vst [vmem:[#allocation3] sm:$0x1] %v805_v4 }
 0x18b   : > { %v810_v5 = vld [vmem:[#allocation2] sm:$0x1]  ;;  %v813_v6 = vld [vmem:[#allocation3] sm:$0x1] }
 0x18c   : > { %v811_v7 = vmul.f32 0.125, %v810_v5  ;;  %v814_v8 = vmul.f32 0.125, %v813_v6 }
 0x18e   : > { %v812_v9 = vpack.c.bf16 %v811_v7, %v811_v7  ;;  %v815_v10 = vpack.c.bf16 %v814_v8, %v814_v8 }
 0x190   : > { %1375 = vmatmul.mubr.bf16.vlgmr.msra.gmra.mxu1 %v812_v9  ;;  %1355 = vmatmul.mubr.bf16.vlgmr.msra.gmra.mxu0 %v815_v10 }
 0x250   : > { %v1018_v11 = vpop.f32.mrf.mxu1  ;;  %v930_v12 = vpop.f32.mrf.mxu0 }
 0x251   : > { %v1019_v14 = vadd.f32 %v1018_v11, %v930_v12 }
 0x252   : > { %v1376_v15 = vpop.f32.mrf.mxu1  ;;  %v1356_v16 = vpop.f32.mrf.mxu0 }
 0x253   : > { %v1025_v17 = vadd.f32 %v1024_v13, %v1019_v14 }
 0x254   : > { %v1021_v18 = vpop.f32.mrf.mxu1  ;;  %v933_v19 = vpop.f32.mrf.mxu0 }
 0x255   : > { %1026 = vst [vmem:[%s545_s11] sm:$0x1] %v1025_v17 }
 0x256   : > { %v1377_v20 = vpop.f32.mrf.mxu1  ;;  %v1357_v21 = vpop.f32.mrf.mxu0 }
 0x257   : > { %1731 = shalt.err (!%p1728_p12)
}
 0x258   : > { %s1732_s27 = scalar_lea.hbm %s2148_s8, 16  ;;  %s1736_s9 = scalar_lea.hbm %s2243_s12, 32 }
 0x259   : > { %p1733_p1 = scmp.ne.s32.totalorder %s2148_s8, %s1732_s27  ;;  %p1737_p10 = scmp.lt.s32.totalorder %s2148_s8, %s2243_s12 }
 0x25a   : > { %p1738_p3 = scmp.lt.s32.totalorder %s1736_s9, %s1732_s27 }
 0x25b   : > { %p1734_p4 = pnand %p1733_p1, %p2013_p8 }
 0x25c   : > { %p1739_p6 = por %p1738_p3, %p1737_p10 }
 0x25d   : > { %p1735_p9 = pneg %p1734_p4 }
 0x25f   : > { %p1740_p5 = pnand %p1739_p6, %p1735_p9 }
 0x261   : > { %1743 = shalt.err (!%p1740_p5)
}
 0x262   : > { %1402 = dma.vmem_to_hbm [thread:$0]  (%p2013_p8), %s2150_s3, 16, %s2148_s8, %s1028_s20  }
 0x263 PF: > { %s1052_s29 = sand.u32 1, %s1794_s17   ;;  %p2244_p7 = scmp.ge.s32.totalorder %s1814_s22, 2 }
 0x264   : > { %s1053_s28 = scalar_lea.sflag [#allocation6], %s1052_s29 }
 0x265   : > { %p1428_p13 = pnand %p2244_p7, %p2021_p11 }
 0x267   : > { %p1429_p0 = pneg %p1428_p13 }
 0x269   : > { %1789 = dma.done.wait (%p1429_p0), %s1053_s28, 16  }
 0x26a   : > { %1791 = vsyncadd (%p1429_p0), %s1053_s28, 4294967280  ;;  %s32_s22 = sadd.s32 1, %s1814_s22   ;;  %s2245_s30 = sld [smem:[#allocation25_spill]] }
 0x26b   : > { %p29_p2 = scmp.ge.s32.totalorder %s32_s22, 4   ;;  %s2246_s20 = sld [smem:[#allocation23_spill]] }
 0x26c   : > { %s2247_s21 = sld [smem:[#allocation24_spill]]  ;;  %s2248_s17 = smov %s1798_s18 }
 0x26d   : > { %s2249_s18 = smov %s1802_s19  ;;  %31 = sbr.rel (!%p29_p2) target bundleno = 17 (0x11), region = 154 }
 0x270   : > { %s2250_s19 = smov %s2245_s30 }
 0x272   :  { %1057 = vsyncpa [#allocation5], 1 }
 0x273   :  { %1059 = vsyncpa [#allocation5 + $0x1], 1 }
 0x274   :  { %1060 = vsyncpa [#allocation8], 1 }
 0x275   :  { %1062 = vsyncpa [#allocation8 + $0x1], 1 }
 0x276   :  { %1063 = vsyncpa [#allocation11], 1 }
 0x277   :  { %1064 = vsyncpa [#allocation14], 1 }
 0x278   :  { %1065 = vsyncpa [#allocation6], 1 }
 0x279   :  { %1067 = vsyncpa [#allocation6 + $0x1], 1 }

</bundles_post_ra>
